<compile_context>
chip_gen: v6e
topology: v6e:2x2x1
jax: 0.10.0
libtpu: 0.0.40
codegen_flags: <defaults>
</compile_context>

<pallas_src>
import math

import jax
import jax.numpy as jnp
from jax import lax
from jax.experimental import pallas as pl
from jax.experimental.pallas import tpu as pltpu

HIDDEN = 64


def qnet_kernel(x_ref, w1_ref, b1_ref, w2_ref, b2_ref, w3t_ref, b3t_ref, ot_ref):
    # Layer 1: (tb, D_in) @ (D_in, H) on the MXU — bf16 operands, f32 accumulate.
    x = x_ref[...].astype(jnp.bfloat16)
    h1 = jnp.dot(x, w1_ref[...], preferred_element_type=jnp.float32) + b1_ref[...]
    h1 = jnp.maximum(h1, 0.0)                      # bias add + ReLU in f32 (VPU)

    # Layer 2: (tb, H) @ (H, H).
    h2 = jnp.dot(h1.astype(jnp.bfloat16), w2_ref[...],
                 preferred_element_type=jnp.float32) + b2_ref[...]
    h2 = jnp.maximum(h2, 0.0)

    # Layer 3, transposed form: out_t[d, n] = sum_h w3t[d, h] * h2[n, h].
    # The 4-row matrix is the LHS (one short sublane-group stream on the MXU)
    # and the result is already the lane-dense (D_out, tb) output slab, so no
    # explicit transpose in the epilogue.  b3t is (D_out, 1): broadcasts over
    # the lane (batch) axis.
    out_t = lax.dot_general(
        w3t_ref[...], h2.astype(jnp.bfloat16),
        (((1,), (1,)), ((), ())),
        preferred_element_type=jnp.float32,
    ) + b3t_ref[...]

    ot_ref[...] = out_t.astype(ot_ref.dtype)


def _round_up(n, m):
    return ((n + m - 1) // m) * m


def _pick_batch_tile(B):
    if B <= 512:
        # Single grid step; block == full array so no (8,128) alignment
        # constraint applies and no tail masking is needed.
        return B
    # Large batch: tile is a multiple of 128 (unmasked lane-dense output stores
    # even with a partial tail block), chosen so the grid has >= 2 steps (both
    # v7x TensorCores get work on the 'parallel' axis) and capped at 2048 rows
    # so the ~0.35us/step grid overhead is amortized on single-TC v5e/v6e while
    # the per-step working set stays well under every chip's scoped-VMEM limit.
    return min(2048, _round_up(pl.cdiv(B, 2), 128))


def prepare_qnet_params(params):
    """One-time weight prep (hoist out of any hot loop / jitted train step).

    bf16 MXU weights; w3 pre-transposed to (D_out, H); b3 reshaped to
    (D_out, 1) so the bias broadcasts over the batch (lane) axis of the
    transposed layer-3 output.  Biases stay f32.
    """
    return {
        "w1": params["w1"].astype(jnp.bfloat16),
        "b1": params["b1"].reshape(1, -1).astype(jnp.float32),
        "w2": params["w2"].astype(jnp.bfloat16),
        "b2": params["b2"].reshape(1, -1).astype(jnp.float32),
        "w3t": params["w3"].T.astype(jnp.bfloat16),
        "b3t": params["b3"].reshape(-1, 1).astype(jnp.float32),
    }


def qnet_forward_t(x, params, *, batch_tile=None):
    """Fused QNet forward.  x: (B, D_in) f32 or bf16.  Returns (D_out, B) f32.

    The kernel's natural output layout is (D_out, B) (batch on the lane axis,
    unmasked lane-dense stores).  Consumers reducing over actions
    (argmax/max over axis 0) should use this directly; use qnet_forward() when
    the PyTorch (B, D_out) layout is required.
    """
    if "w3t" not in params:
        params = prepare_qnet_params(params)   # prefer hoisting this per-call cost

    B, D_in = x.shape
    H = params["w1"].shape[1]
    D_out = params["w3t"].shape[0]

    tb = _pick_batch_tile(B) if batch_tile is None else batch_tile
    grid = (pl.cdiv(B, tb),)                   # last block may be partial: no jnp.pad
    const = lambda shape: pl.BlockSpec(shape, lambda i: (0,) * len(shape))

    flops = 2 * B * (D_in * H + H * H + H * D_out)
    bytes_accessed = (
        B * D_in * x.dtype.itemsize            # x read
        + D_out * B * 4                        # output write (f32)
        + (D_in * H + H * H + H * D_out) * 2   # bf16 weights (VMEM-resident)
        + (2 * H + D_out) * 4                  # f32 biases
    )

    return pl.pallas_call(
        qnet_kernel,
        out_shape=jax.ShapeDtypeStruct((D_out, B), jnp.float32),
        grid_spec=pltpu.PrefetchScalarGridSpec(
            num_scalar_prefetch=0,
            grid=grid,
            in_specs=[
                pl.BlockSpec((tb, D_in), lambda i: (i, 0)),  # only per-step DMA
                const((D_in, H)),
                const((1, H)),
                const((H, H)),
                const((1, H)),
                const((D_out, H)),
                const((D_out, 1)),
            ],
            out_specs=pl.BlockSpec((D_out, tb), lambda i: (0, i)),
        ),
        compiler_params=pltpu.CompilerParams(
            dimension_semantics=("parallel",),
        ),
        cost_estimate=pl.CostEstimate(
            flops=flops, transcendentals=0, bytes_accessed=bytes_accessed),
    )(x, params["w1"], params["b1"], params["w2"], params["b2"],
      params["w3t"], params["b3t"])


def qnet_forward(x, params, *, batch_tile=None):
    """PyTorch-layout result (B, D_out).

    The transpose of the tiny (D_out, B) slab is a separate XLA op; latency
    sensitive consumers (e.g. action argmax) should call qnet_forward_t.
    """
    return qnet_forward_t(x, params, batch_tile=batch_tile).T


def init_qnet_params(key, input_dim, output_dim, hidden=HIDDEN, dtype=jnp.float32):
    """Mirrors PyTorch nn.Linear default init (U(-1/sqrt(fan_in), +1/sqrt(fan_in)))."""
    ks = jax.random.split(key, 6)

    def linear(kw, kb, fan_in, fan_out):
        bound = 1.0 / math.sqrt(fan_in)
        w = jax.random.uniform(kw, (fan_in, fan_out), dtype, -bound, bound)
        b = jax.random.uniform(kb, (1, fan_out), dtype, -bound, bound)
        return w, b

    w1, b1 = linear(ks[0], ks[1], input_dim, hidden)
    w2, b2 = linear(ks[2], ks[3], hidden, hidden)
    w3, b3 = linear(ks[4], ks[5], hidden, output_dim)
    return {"w1": w1, "b1": b1, "w2": w2, "b2": b2, "w3": w3, "b3": b3}


def qnet_reference(x, p):
    h1 = jnp.maximum(x @ p["w1"] + p["b1"], 0.0)
    h2 = jnp.maximum(h1 @ p["w2"] + p["b2"], 0.0)
    return h2 @ p["w3"] + p["b3"]


if __name__ == "__main__":
    key = jax.random.PRNGKey(0)
    k_x, k_p, k_x2 = jax.random.split(key, 3)

    D_in, D_out = 32, 4                # QNet(input_shape=(32,), output_shape=4)
    raw_params = init_qnet_params(k_p, D_in, D_out)
    params = prepare_qnet_params(raw_params)   # hoisted one-time bf16/transpose prep

    # Small demo batch: single full-array block, grid=(1,).
    B = 8
    x = jax.random.normal(k_x, (B, D_in), dtype=jnp.float32)
    out = jax.block_until_ready(qnet_forward(x, params))
    ref = qnet_reference(x, raw_params)
    assert out.shape == (B, D_out)
    # bf16 MXU operands (f32 accumulation) -> tolerate ~1e-2 level deviation
    # vs. a pure-f32 PyTorch QNet.
    assert jnp.allclose(out, ref, atol=3e-2, rtol=3e-2), "mismatch vs reference (B=8)"

    # Larger, non-tile-multiple batch: exercises the multi-step 'parallel' grid
    # with a partial tail block (no jnp.pad, no output slice) and the native
    # transposed (D_out, B) output path.
    B2 = 1000
    x2 = jax.random.normal(k_x2, (B2, D_in), dtype=jnp.float32)
    out2_t = jax.block_until_ready(qnet_forward_t(x2, params))
    ref2 = qnet_reference(x2, raw_params)
    assert out2_t.shape == (D_out, B2)
    assert jnp.allclose(out2_t.T, ref2, atol=3e-2, rtol=3e-2), "mismatch vs reference (B=1000)"

    print("KERNEL_OK")
</pallas_src>

<mosaic_0001>
module attributes {stable_mosaic.version = 11 : i64} {
  func.func @qnet_kernel(%arg0: i32, %arg1: memref<8x32xf32, #tpu.memory_space<vmem>>, %arg2: memref<32x64xbf16, #tpu.memory_space<vmem>>, %arg3: memref<1x64xf32, #tpu.memory_space<vmem>>, %arg4: memref<64x64xbf16, #tpu.memory_space<vmem>>, %arg5: memref<1x64xf32, #tpu.memory_space<vmem>>, %arg6: memref<4x64xbf16, #tpu.memory_space<vmem>>, %arg7: memref<4x1xf32, #tpu.memory_space<vmem>>, %arg8: memref<4x8xf32, #tpu.memory_space<vmem>>) attributes {dimension_semantics = [#tpu.dimension_semantics<parallel>], iteration_bounds = array<i64: 1>, scalar_prefetch = 0 : i64, scratch_operands = 0 : i64, tpu.core_type = #tpu.core_type<tc>, window_params = [{transform_indices = @transform_0, window_bounds = array<i64: 8, 32>}, {pipeline_mode = #tpu.pipeline_mode<synchronous>, transform_indices = @transform_1, window_bounds = array<i64: 32, 64>}, {pipeline_mode = #tpu.pipeline_mode<synchronous>, transform_indices = @transform_2, window_bounds = array<i64: 1, 64>}, {pipeline_mode = #tpu.pipeline_mode<synchronous>, transform_indices = @transform_3, window_bounds = array<i64: 64, 64>}, {pipeline_mode = #tpu.pipeline_mode<synchronous>, transform_indices = @transform_4, window_bounds = array<i64: 1, 64>}, {pipeline_mode = #tpu.pipeline_mode<synchronous>, transform_indices = @transform_5, window_bounds = array<i64: 4, 64>}, {pipeline_mode = #tpu.pipeline_mode<synchronous>, transform_indices = @transform_6, window_bounds = array<i64: 4, 1>}, {transform_indices = @transform_7, window_bounds = array<i64: 4, 8>}]} {
    %c0 = arith.constant 0 : index
    %c0_0 = arith.constant 0 : index
    %0 = vector.load %arg1[%c0, %c0_0] : memref<8x32xf32, #tpu.memory_space<vmem>>, vector<8x32xf32>
    %1 = arith.truncf %0 : vector<8x32xf32> to vector<8x32xbf16>
    %c0_1 = arith.constant 0 : index
    %c0_2 = arith.constant 0 : index
    %2 = vector.load %arg2[%c0_1, %c0_2] : memref<32x64xbf16, #tpu.memory_space<vmem>>, vector<32x64xbf16>
    %cst = arith.constant dense<0.000000e+00> : vector<8x64xf32>
    %3 = tpu.matmul %1, %2, %cst {dimension_numbers = #tpu.dot_dimension_numbers<[1], [0], [0], [1], [0, 0, 1, 1], [], []>} : vector<8x32xbf16>, vector<32x64xbf16>, vector<8x64xf32> -> vector<8x64xf32>
    %c0_3 = arith.constant 0 : index
    %c0_4 = arith.constant 0 : index
    %4 = vector.load %arg3[%c0_3, %c0_4] : memref<1x64xf32, #tpu.memory_space<vmem>>, vector<1x64xf32>
    %5 = vector.broadcast %4 : vector<1x64xf32> to vector<8x64xf32>
    %6 = arith.addf %3, %5 : vector<8x64xf32>
    %cst_5 = arith.constant 0.000000e+00 : f32
    %7 = vector.broadcast %cst_5 : f32 to vector<8x64xf32>
    %8 = arith.maximumf %6, %7 : vector<8x64xf32>
    %9 = arith.truncf %8 : vector<8x64xf32> to vector<8x64xbf16>
    %c0_6 = arith.constant 0 : index
    %c0_7 = arith.constant 0 : index
    %10 = vector.load %arg4[%c0_6, %c0_7] : memref<64x64xbf16, #tpu.memory_space<vmem>>, vector<64x64xbf16>
    %cst_8 = arith.constant dense<0.000000e+00> : vector<8x64xf32>
    %11 = tpu.matmul %9, %10, %cst_8 {dimension_numbers = #tpu.dot_dimension_numbers<[1], [0], [0], [1], [0, 0, 1, 1], [], []>} : vector<8x64xbf16>, vector<64x64xbf16>, vector<8x64xf32> -> vector<8x64xf32>
    %c0_9 = arith.constant 0 : index
    %c0_10 = arith.constant 0 : index
    %12 = vector.load %arg5[%c0_9, %c0_10] : memref<1x64xf32, #tpu.memory_space<vmem>>, vector<1x64xf32>
    %13 = vector.broadcast %12 : vector<1x64xf32> to vector<8x64xf32>
    %14 = arith.addf %11, %13 : vector<8x64xf32>
    %cst_11 = arith.constant 0.000000e+00 : f32
    %15 = vector.broadcast %cst_11 : f32 to vector<8x64xf32>
    %16 = arith.maximumf %14, %15 : vector<8x64xf32>
    %c0_12 = arith.constant 0 : index
    %c0_13 = arith.constant 0 : index
    %17 = vector.load %arg6[%c0_12, %c0_13] : memref<4x64xbf16, #tpu.memory_space<vmem>>, vector<4x64xbf16>
    %18 = arith.truncf %16 : vector<8x64xf32> to vector<8x64xbf16>
    %cst_14 = arith.constant dense<0.000000e+00> : vector<4x8xf32>
    %19 = tpu.matmul %17, %18, %cst_14 {dimension_numbers = #tpu.dot_dimension_numbers<[1], [1], [0], [0], [0, 0, 1, 0], [], []>} : vector<4x64xbf16>, vector<8x64xbf16>, vector<4x8xf32> -> vector<4x8xf32>
    %c0_15 = arith.constant 0 : index
    %c0_16 = arith.constant 0 : index
    %20 = vector.load %arg7[%c0_15, %c0_16] : memref<4x1xf32, #tpu.memory_space<vmem>>, vector<4x1xf32>
    %21 = vector.broadcast %20 : vector<4x1xf32> to vector<4x8xf32>
    %22 = arith.addf %19, %21 : vector<4x8xf32>
    %c0_17 = arith.constant 0 : index
    %c0_18 = arith.constant 0 : index
    %23 = vector.load %arg8[%c0_17, %c0_18] : memref<4x8xf32, #tpu.memory_space<vmem>>, vector<4x8xf32>
    tpu.vector_store %arg8[%c0_17, %c0_18], %22 {strides = array<i32>} : memref<4x8xf32, #tpu.memory_space<vmem>>, vector<4x8xf32>,
    return
  }
  func.func @transform_0(%arg0: i32) -> (i32, i32) {
    %c0_i32 = arith.constant 0 : i32
    %c0_i32_0 = arith.constant 0 : i32
    return %arg0, %c0_i32 : i32, i32
  }
  func.func @transform_1(%arg0: i32) -> (i32, i32) {
    %c0_i32 = arith.constant 0 : i32
    %c0_i32_0 = arith.constant 0 : i32
    %c0_i32_1 = arith.constant 0 : i32
    return %c0_i32, %c0_i32_0 : i32, i32
  }
  func.func @transform_2(%arg0: i32) -> (i32, i32) {
    %c0_i32 = arith.constant 0 : i32
    %c0_i32_0 = arith.constant 0 : i32
    %c0_i32_1 = arith.constant 0 : i32
    return %c0_i32, %c0_i32_0 : i32, i32
  }
  func.func @transform_3(%arg0: i32) -> (i32, i32) {
    %c0_i32 = arith.constant 0 : i32
    %c0_i32_0 = arith.constant 0 : i32
    %c0_i32_1 = arith.constant 0 : i32
    return %c0_i32, %c0_i32_0 : i32, i32
  }
  func.func @transform_4(%arg0: i32) -> (i32, i32) {
    %c0_i32 = arith.constant 0 : i32
    %c0_i32_0 = arith.constant 0 : i32
    %c0_i32_1 = arith.constant 0 : i32
    return %c0_i32, %c0_i32_0 : i32, i32
  }
  func.func @transform_5(%arg0: i32) -> (i32, i32) {
    %c0_i32 = arith.constant 0 : i32
    %c0_i32_0 = arith.constant 0 : i32
    %c0_i32_1 = arith.constant 0 : i32
    return %c0_i32, %c0_i32_0 : i32, i32
  }
  func.func @transform_6(%arg0: i32) -> (i32, i32) {
    %c0_i32 = arith.constant 0 : i32
    %c0_i32_0 = arith.constant 0 : i32
    %c0_i32_1 = arith.constant 0 : i32
    return %c0_i32, %c0_i32_0 : i32, i32
  }
  func.func @transform_7(%arg0: i32) -> (i32, i32) {
    %c0_i32 = arith.constant 0 : i32
    %c0_i32_0 = arith.constant 0 : i32
    return %c0_i32, %arg0 : i32, i32
  }
}

</mosaic_0001>

<bundles_post_ra>
// kernel: tpu_custom_call.1
= control target key start
LH: loop header
LB: loop body
LE: loop exit
PB: predicated region body
PF: predicated region fallthrough
CT: control target
= control target key end

     0   :  { %12 = vsyncpa [#allocation3], 0  ;;  %s522_s0 = inlined_call_operand.hbm [shape: f32[8,32], index: 0, kind: input, shape index: {}]   ;;  %s523_s1 = inlined_call_operand.hbm [shape: bf16[32,64], index: 1, kind: input, shape index: {}]   ;;  %s524_s2 = inlined_call_operand.vmem [shape: f32[1,64], index: 2, kind: input, shape index: {}]   ;;  %s525_s3 = inlined_call_operand.hbm [shape: bf16[64,64], index: 3, kind: input, shape index: {}]   ;;  %s526_s4 = inlined_call_operand.vmem [shape: f32[1,64], index: 4, kind: input, shape index: {}]   ;;  %s527_s5 = inlined_call_operand.vmem [shape: bf16[4,64], index: 5, kind: input, shape index: {}]   ;;  %s528_s6 = inlined_call_operand.vmem [shape: f32[4,1], index: 6, kind: input, shape index: {}]   ;;  %s529_s7 = inlined_call_operand.hbm [shape: f32[4,8], index: 7, kind: output, shape index: {}]  }
   0x1   :  { %13 = vsyncpa [#allocation6], 0 }
   0x2   :  { %14 = vsyncpa [#allocation4], 0  ;;  %s443_s24 = smov [#allocation5]  }
   0x3   :  { %s30_s25 = sshll.u32 %s443_s24, 4  ;;  %s31_s25 = int_to_ptr.vmem [resolvable:$true] %s30_s25 }
   0x4   :  { %s365_s26 = scalar_lea.vmem %s31_s25, 256  ;;  %p370_p1 = scmp.lt.s32.totalorder %s31_s25, %s31_s25 }
   0x5   :  { %p366_p0 = scmp.ne.s32.totalorder %s31_s25, %s365_s26  ;;  %p371_p2 = scmp.lt.s32.totalorder %s365_s26, %s365_s26 }
   0x7   :  { %p372_p3 = por %p371_p2, %p370_p1 }
   0x9   :  { %p373_p4 = pnand %p372_p3, %p366_p0 }
   0xb   :  { %376 = shalt.err (!%p373_p4)
}
   0xc   :  { %s444_s27 = smov 64   ;;  %s445_s28 = smov 4  }
   0xd   :  { %36 = dma.hbm_to_vmem [thread:$0]  %s523_s1, 256, %s31_s25, [#allocation6], %s444_s27, %s444_s27, %s445_s28  }
   0xe   :  { %s446_s8 = smov [#allocation2]   ;;  %s447_s10 = smov [#allocation7]  }
   0xf   :  { %s21_s9 = sshll.u32 %s446_s8, 4  ;;  %s44_s11 = sshll.u32 %s447_s10, 4  ;;  %s22_s9 = int_to_ptr.vmem [resolvable:$true] %s21_s9  ;;  %s45_s11 = int_to_ptr.vmem [resolvable:$true] %s44_s11 }
  0x10   :  { %s385_s12 = scalar_lea.vmem %s22_s9, 128  ;;  %p390_p6 = scmp.lt.s32.totalorder %s22_s9, %s22_s9 }
  0x11   :  { %p386_p5 = scmp.ne.s32.totalorder %s22_s9, %s385_s12  ;;  %p391_p7 = scmp.lt.s32.totalorder %s385_s12, %s385_s12 }
  0x13   :  { %p392_p8 = por %p391_p7, %p390_p6 }
  0x15   :  { %p393_p9 = pnand %p392_p8, %p386_p5 }
  0x17   :  { %396 = shalt.err (!%p393_p9)
}
  0x18   :  { %24 = dma.hbm_to_vmem [thread:$0]  %s522_s0, 128, %s22_s9, [#allocation3]  }
  0x19   :  { %s405_s15 = scalar_lea.vmem %s45_s11, 512  ;;  %p410_p11 = scmp.lt.s32.totalorder %s45_s11, %s45_s11 }
  0x1a   :  { %p406_p10 = scmp.ne.s32.totalorder %s45_s11, %s405_s15  ;;  %p411_p12 = scmp.lt.s32.totalorder %s405_s15, %s405_s15 }
  0x1c   :  { %p412_p13 = por %p411_p12, %p410_p11 }
  0x1e   :  { %p413_p0 = pnand %p412_p13, %p406_p10 }
  0x20   :  { %416 = shalt.err (!%p413_p0)
}
  0x21   :  { %50 = dma.hbm_to_vmem [thread:$0]  %s525_s3, 512, %s45_s11, [#allocation6], %s444_s27, %s444_s27, %s445_s28  }
  0x22   :  { %437 = dma.done.wait [#allocation3], 128  }
  0x23   :  { %438 = vsyncadd [#allocation3], 4294967168 }
  0x24   :  { %439 = dma.done.wait [#allocation6], 768  }
  0x25   :  { %440 = vsyncadd [#allocation6], 4294966528  ;;  %v448_v0 = vmov 0.0   ;;  %vm449_vm0 = vmmov 0   ;;  %v351_v1 = vld [vmem:[#allocation5 + $0x8] sm:$0xff]   ;;  %v352_v2 = vld [vmem:[#allocation5] sm:$0xff]  }
  0x26   :  { %315 = vmatprep.subr.bf16.mxu0 %v448_v0  ;;  %319 = vmatprep.mubr.msk.bf16.mxu0 %vm449_vm0, %v448_v0  ;;  %v67_v3 = vld [vmem:[#allocation2] sm:$0xff]  ;;  %v353_v4 = vld [vmem:[#allocation7 + $0x18] sm:$0xff]   ;;  %v354_v5 = vld [vmem:[#allocation7 + $0x10] sm:$0xff]   ;;  %vm92_vm1 = vcmask 261120   ;;  %vm177_vm2 = vcmask 523264   ;;  %v450_v18 = vmov 0  }
  0x27   :  { %323 = vmatprep.subr.bf16.mxu1 %v448_v0  ;;  %331 = vmatprep.mubr.msk.bf16.mxu1 %vm449_vm0, %v448_v0  ;;  %v68_v6 = vpack.c.bf16 %v67_v3, %v67_v3  ;;  %v355_v7 = vld [vmem:[#allocation7 + $0x8] sm:$0xff]   ;;  %v356_v8 = vld [vmem:[#allocation7] sm:$0xff]   ;;  %vm276_vm3 = vcmask 60416  }
  0x28   :  { %316 = vmatpush3.bf16.msra.mxu0 %v351_v1  ;;  %324 = vmatpush3.bf16.msra.mxu1 %v353_v4  ;;  %v294_v9 = vld [vmem:[%s524_s2] ss:$0 sm:$0xff] }
  0x29   :  { %317 = vmatprep.subr.bf16.mxu0 %v448_v0  ;;  %325 = vmatprep.subr.bf16.mxu1 %v448_v0  ;;  %v224_v17 = vld [vmem:[%s528_s6] sm:$0xf]  ;;  %s451_s6 = smov [#allocation8]  }
  0x2a   :  { %350 = vset.pattern.permute.xlu0 %v450_v18  ;;  %v298_v19 = vld [vmem:[%s526_s4] ss:$0 sm:$0xff]  ;;  %s284_s22 = sshll.u32 %s451_s6, 4  ;;  %s285_s22 = int_to_ptr.vmem [resolvable:$true] %s284_s22 }
  0x2b   :  { %227 = vperm.xlu0 %350, %v224_v17   ;;  %v222_v28 = vld [vmem:[%s527_s5] sm:$0x3]  ;;  %s417_s4 = scalar_lea.vmem %s285_s22, 64  ;;  %p422_p2 = scmp.lt.s32.totalorder %s285_s22, %s285_s22 }
  0x2c   :  { %318 = vmatpush3.bf16.msra.mxu0 %v352_v2  ;;  %326 = vmatpush3.bf16.msra.mxu1 %v354_v5  ;;  %p418_p1 = scmp.ne.s32.totalorder %s285_s22, %s417_s4  ;;  %p423_p3 = scmp.lt.s32.totalorder %s417_s4, %s417_s4 }
  0x2d   :  { %335 = vmatprep.subr.bf16.mxu0 %v448_v0  ;;  %327 = vmatprep.subr.bf16.mxu1 %v448_v0 }
  0x2e   :  { %p424_p4 = por %p423_p3, %p422_p2 }
  0x2f   :  { %320 = vmatmul.mubr.msk.bf16.vlgmr.msra.gmra.mxu0 %vm92_vm1, %v68_v6 }
  0x30   :  { %337 = vmatprep.mubr.msk.bf16.mxu0 %vm449_vm0, %v448_v0  ;;  %328 = vmatpush3.bf16.msra.mxu1 %v355_v7  ;;  %p425_p5 = pnand %p424_p4, %p418_p1 }
  0x31   :  { %329 = vmatprep.subr.bf16.mxu1 %v448_v0 }
  0x34   :  { %330 = vmatpush3.bf16.msra.mxu1 %v356_v8 }
  0xa6   :  { %v228_v29 = vpop.permute.xlu0 %227 }
  0xef   :  { %v130_v10 = vpop.f32.mrf.mxu0 }
  0xf0   :  { %v131_v11 = vadd.f32 %v294_v9, %v130_v10 }
  0xf1   :  { %v321_v12 = vpop.f32.mrf.mxu0 }
  0xf2   :  { %v136_v13 = vmax.f32 %v131_v11, 0.0 }
  0xf3   :  { %v133_v14 = vpop.f32.mrf.mxu0 }
  0xf4   :  { %v137_v15 = vpack.c.bf16 %v136_v13, %v136_v13 }
  0xf5   :  { %v322_v16 = vpop.f32.mrf.mxu0 }
  0xf6   :  { %332 = vmatmul.mubr.msk.bf16.vlgmr.msra.gmra.mxu1 %vm177_vm2, %v137_v15 }
 0x1b6   :  { %v215_v20 = vpop.f32.mrf.mxu1 }
 0x1b7   :  { %v216_v21 = vadd.f32 %v298_v19, %v215_v20 }
 0x1b8   :  { %v333_v22 = vpop.f32.mrf.mxu1 }
 0x1b9   :  { %v221_v23 = vmax.f32 %v216_v21, 0.0 }
 0x1ba   :  { %v218_v24 = vpop.f32.mrf.mxu1 }
 0x1bb   :  { %v223_v25 = vpack.c.bf16 %v221_v23, %v221_v23 }
 0x1bc   :  { %v334_v26 = vpop.f32.mrf.mxu1 }
 0x1bd   :  { %v234_v27 = vsel %vm177_vm2, %v223_v25, 0 }
 0x1be   :  { %336 = vmatpush3.bf16.xpose.msra.mxu0 %v234_v27 }
 0x1c5   :  { %338 = vmatmul.mubr.msk.bf16.vlgmr.msra.gmra.mxu0 %vm177_vm2, %v222_v28 }
 0x285   :  { %v270_v30 = vpop.f32.mrf.mxu0 }
 0x286   :  { %v271_v31 = vadd.f32 %v270_v30, %v228_v29 }
 0x287   :  { %v339_v32 = vpop.f32.mrf.mxu0 }
 0x288   :  { %277 = vst.msk [vmem:[#allocation8] sm:$0xf] %vm276_vm3, %v271_v31 }
 0x289   :  { %v273_v33 = vpop.f32.mrf.mxu0 }
 0x28a   :  { %428 = shalt.err (!%p425_p5)
}
 0x28b   :  { %287 = dma.vmem_to_hbm [thread:$0]  %s285_s22, 64, %s529_s7, [#allocation4]   ;;  %v340_v34 = vpop.f32.mrf.mxu0 }
 0x28c   :  { %441 = dma.done.wait [#allocation4], 64  }
 0x28d   :  { %442 = vsyncadd [#allocation4], 4294967232 }
 0x28e   :  { %291 = vsyncpa [#allocation3], 1 }
 0x28f   :  { %292 = vsyncpa [#allocation6], 1 }
 0x290   :  { %293 = vsyncpa [#allocation4], 1 }

</bundles_post_ra>
